<compile_context>
chip_gen: v6e
topology: v6e:2x2x1
jax: 0.10.0
libtpu: 0.0.40
codegen_flags: <defaults>
</compile_context>

<pallas_src>
import jax
import jax.numpy as jnp
from jax import lax
from jax.experimental import pallas as pl
from jax.experimental.pallas import tpu as pltpu

# ---- geometry implied by the module ----
CIN, H, W = 4, 10, 10
KH = KW = 3
C1, C2 = 12, 12                                   # conv1 / conv2 out channels
OH, OW = H - KH + 1, W - KW + 1                   # 8, 8   (valid conv)
PH_T, PH_B, PW_L, PW_R = 20, 2, 23, 7             # spatial part of F.pad(..., (23,7,20,2,3,1))
PC_LO = 3                                         # channel pad below
HP, WP = OH + PH_T + PH_B, OW + PW_L + PW_R       # 30, 38
M_OUT = HP * WP                                   # 1140 output positions per sample
S = (OH - 1) * W + OW                             # 78: active-window width on flat input
KK = KH * KW * CIN                                # 36: fused contraction size
EPS = 1e-5


def _make_kernel(n_batch):
    inv_total = 1.0 / float(n_batch * M_OUT)

    def kernel(x_ref, wf_ref, c_ref, o_ref, col_ref):
        b_f = c_ref[:, 0:1]     # fused bias  (w2_eff @ b1 + b2)                 (12, 1)
        b2 = c_ref[:, 1:2]      # conv2 bias  = exact value at padded positions  (12, 1)
        g = c_ref[:, 2:3]       # gamma
        bt = c_ref[:, 3:4]      # beta

        # BN lane mask over the 78 im2col columns: (c % 10) < 8, built in-kernel (no DMA).
        lane = lax.broadcasted_iota(jnp.int32, (1, S), 1)
        lrow = jnp.zeros((1, S), jnp.int32)
        for k in range(1, OH):                         # lane // W without integer division
            lrow = lrow + (lane >= k * W).astype(jnp.int32)
        msk = ((lane - W * lrow) < OW).astype(jnp.float32)           # (1, 78)

        # ---- fused conv1+conv2 and one-pass centered BN statistics ----
        s_acc = jnp.zeros((C2, 1), jnp.float32)
        ss_acc = jnp.zeros((C2, 1), jnp.float32)
        y2s = []
        # TODO(synk): for large N switch to lax.fori_loop + an (N, C2, S) VMEM scratch and a
        #             "parallel" batch grid axis (sized against v7x's 64 MiB VMEM).
        for n in range(n_batch):                       # N is tiny here; fully unrolled
            xf = x_ref[n, :, :]                        # (4, 100): one vreg
            # im2col: 9 lane-shifted (4,78) tap slices stacked on sublanes in VMEM scratch.
            for kh in range(KH):
                for kw in range(KW):
                    t = kh * KW + kw
                    col_ref[t * CIN:(t + 1) * CIN, :] = xf[:, kh * W + kw: kh * W + kw + S]
            # ONE (12,36)@(36,78) MXU matmul replaces 9 tap matmuls + 9 VPU accumulates.
            y2 = jnp.dot(wf_ref[...], col_ref[...],
                         preferred_element_type=jnp.float32) + b_f   # (12, 78)
            y2s.append(y2)
            d = (y2 - b2) * msk          # centered at b2 -> padded positions contribute 0
            s_acc = s_acc + jnp.sum(d, axis=1, keepdims=True)
            ss_acc = ss_acc + jnp.sum(d * d, axis=1, keepdims=True)

        mean_c = s_acc * inv_total                     # E[y] - b2 over all N*1140 positions
        var = ss_acc * inv_total - mean_c * mean_c     # biased variance (training-mode BN)
        scale = g * lax.rsqrt(var + EPS)
        shift = bt - (b2 + mean_c) * scale
        pad_val = b2 * scale + shift                   # normalized value of padded positions

        # ---- one-hot scatter matrix (78, 1140) generated from iota (no HBM operand) ----
        cid = lax.broadcasted_iota(jnp.int32, (S, 1), 0)
        crow = jnp.zeros((S, 1), jnp.int32)
        for k in range(1, OH):
            crow = crow + (cid >= k * W).astype(jnp.int32)           # c // W
        ccol = cid - W * crow                                        # c % W
        target = jnp.where(ccol < OW, (PH_T + crow) * WP + PW_L + ccol, -1)   # (78, 1)
        mid = lax.broadcasted_iota(jnp.int32, (S, M_OUT), 1)
        scat = (mid == target).astype(jnp.float32)                   # (78, 1140)

        # ---- lane-dense epilogue: MXU scatter + ONE dense (12, 1140) store per sample ----
        for n in range(n_batch):
            y2n = y2s[n] * scale + shift                             # (12, 78) normalized
            o_ref[n, :, :] = jnp.dot(y2n - pad_val, scat,
                                     preferred_element_type=jnp.float32) + pad_val

    return kernel


def fused_conv_pad_conv_bn(x_nchw, w1, b1, w2_full, b2, gamma, beta):
    """conv1(3x3 valid) -> pad (23,7,20,2,3,1) -> conv2(1x1) -> BatchNorm2d, one kernel.

    Returns NCHW float32 of shape (N, 12, 30, 38)."""
    n_batch = x_nchw.shape[0]
    hi = lax.Precision.HIGHEST

    # layout-only prep of the tiny input + parameter folding (constant-folded under jit)
    x_flat = x_nchw.reshape(n_batch, CIN, H * W).astype(jnp.float32)
    w1_tap = jnp.transpose(w1, (0, 2, 3, 1)).reshape(C1, KK)         # tap-major columns
    w2_eff = w2_full[:, PC_LO:PC_LO + C1, 0, 0]                      # only real channels matter
    w_fused = jnp.dot(w2_eff, w1_tap, precision=hi)                  # (12, 36)
    b_fused = jnp.dot(w2_eff, b1, precision=hi) + b2                 # (12,)
    consts = jnp.stack([b_fused, b2, gamma, beta], axis=1).astype(jnp.float32)   # (12, 4)

    vmem = pl.BlockSpec(memory_space=pltpu.MemorySpace.VMEM)
    out = pl.pallas_call(
        _make_kernel(n_batch),
        out_shape=jax.ShapeDtypeStruct((n_batch, C2, M_OUT), jnp.float32),
        in_specs=[vmem, vmem, vmem],
        out_specs=vmem,
        scratch_shapes=[pltpu.VMEM((KK, S), jnp.float32)],
    )(x_flat, w_fused, consts)
    return out.reshape(n_batch, C2, HP, WP)           # lane-contiguous split: free reshape


def model_forward(x1_nchw, x2_unused, params):
    w1, b1, w2_full, b2, gamma, beta = params
    return fused_conv_pad_conv_bn(x1_nchw, w1, b1, w2_full, b2, gamma, beta)


def reference_forward(x_nchw, w1, b1, w2_full, b2, gamma, beta):
    """Plain-JAX reference mirroring the PyTorch forward (same conv2 channel slice)."""
    hi = jax.lax.Precision.HIGHEST
    out1 = jax.lax.conv_general_dilated(
        x_nchw, w1, (1, 1), 'VALID',
        dimension_numbers=('NCHW', 'OIHW', 'NCHW'), precision=hi)
    out1 = out1 + b1.reshape(1, -1, 1, 1)
    out2 = jnp.pad(out1, ((0, 0), (3, 1), (20, 2), (23, 7)))
    w2 = w2_full[:, :out2.shape[1], 0, 0]
    y = jnp.einsum('oc,nchw->nohw', w2, out2, precision=hi) + b2.reshape(1, -1, 1, 1)
    mean = y.mean(axis=(0, 2, 3), keepdims=True)
    var = ((y - mean) ** 2).mean(axis=(0, 2, 3), keepdims=True)
    return (y - mean) * jax.lax.rsqrt(var + 1e-5) * gamma.reshape(1, -1, 1, 1) \
        + beta.reshape(1, -1, 1, 1)


if __name__ == "__main__":
    key = jax.random.PRNGKey(0)
    k_x1, k_x2, k_w1, k_b1, k_w2, k_b2 = jax.random.split(key, 6)

    # Deterministic parameter init (standard normal, matching torch.randn shapes).
    w1 = jax.random.normal(k_w1, (12, 4, 3, 3), dtype=jnp.float32)
    b1 = jax.random.normal(k_b1, (12,), dtype=jnp.float32)
    w2_full = jax.random.normal(k_w2, (12, 24, 1, 1), dtype=jnp.float32)
    b2 = jax.random.normal(k_b2, (12,), dtype=jnp.float32)
    gamma = jnp.ones((12,), dtype=jnp.float32)     # BatchNorm2d affine defaults
    beta = jnp.zeros((12,), dtype=jnp.float32)
    params = (w1, b1, w2_full, b2, gamma, beta)

    # Inputs (x2 is accepted by forward() but never used).
    x1 = jax.random.normal(k_x1, (1, 4, 10, 10), dtype=jnp.float32)
    x2 = jax.random.normal(k_x2, (1, 4, 10, 10), dtype=jnp.float32)

    out = jax.jit(lambda a, b: model_forward(a, b, params))(x1, x2)
    out = jax.block_until_ready(out)

    assert out.shape == (1, 12, 30, 38), out.shape
    assert out.dtype == jnp.float32

    # sanity check against an independent plain-JAX reference (tighter than before:
    # centered BN statistics removed the E[x^2]-mean^2 cancellation)
    ref = reference_forward(x1, w1, b1, w2_full, b2, gamma, beta)
    max_err = float(jnp.max(jnp.abs(out - ref)))
    assert max_err < 1e-2, f"max abs err vs reference: {max_err}"

    print("KERNEL_OK")
</pallas_src>

<mosaic_0001>
module attributes {stable_mosaic.version = 11 : i64} {
  func.func @kernel(%arg0: memref<1x4x100xf32, #tpu.memory_space<vmem>>, %arg1: memref<12x36xf32, #tpu.memory_space<vmem>>, %arg2: memref<12x4xf32, #tpu.memory_space<vmem>>, %arg3: memref<1x12x1140xf32, #tpu.memory_space<vmem>>, %arg4: memref<36x78xf32, #tpu.memory_space<vmem>>) attributes {dimension_semantics = [], scalar_prefetch = 0 : i64, scratch_operands = 1 : i64, tpu.core_type = #tpu.core_type<tc>} {
    %c0 = arith.constant 0 : index
    %c0_0 = arith.constant 0 : index
    %0 = vector.load %arg2[%c0, %c0_0] : memref<12x4xf32, #tpu.memory_space<vmem>>, vector<12x1xf32>
    %c0_1 = arith.constant 0 : index
    %c1 = arith.constant 1 : index
    %1 = vector.load %arg2[%c0_1, %c1] : memref<12x4xf32, #tpu.memory_space<vmem>>, vector<12x1xf32>
    %c0_2 = arith.constant 0 : index
    %c2 = arith.constant 2 : index
    %2 = vector.load %arg2[%c0_2, %c2] : memref<12x4xf32, #tpu.memory_space<vmem>>, vector<12x1xf32>
    %c0_3 = arith.constant 0 : index
    %c3 = arith.constant 3 : index
    %3 = vector.load %arg2[%c0_3, %c3] : memref<12x4xf32, #tpu.memory_space<vmem>>, vector<12x1xf32>
    %4 = tpu.iota {dimensions = array<i32: 1>} : vector<1x78xi32>
    %c0_i32 = arith.constant 0 : i32
    %5 = vector.broadcast %c0_i32 : i32 to vector<1x78xi32>
    %c10_i32 = arith.constant 10 : i32
    %6 = vector.broadcast %c10_i32 : i32 to vector<1x78xi32>
    %7 = arith.cmpi sge, %4, %6 : vector<1x78xi32>
    %8 = arith.extui %7 : vector<1x78xi1> to vector<1x78xi32>
    %9 = arith.addi %5, %8 : vector<1x78xi32>
    %c20_i32 = arith.constant 20 : i32
    %10 = vector.broadcast %c20_i32 : i32 to vector<1x78xi32>
    %11 = arith.cmpi sge, %4, %10 : vector<1x78xi32>
    %12 = arith.extui %11 : vector<1x78xi1> to vector<1x78xi32>
    %13 = arith.addi %9, %12 : vector<1x78xi32>
    %c30_i32 = arith.constant 30 : i32
    %14 = vector.broadcast %c30_i32 : i32 to vector<1x78xi32>
    %15 = arith.cmpi sge, %4, %14 : vector<1x78xi32>
    %16 = arith.extui %15 : vector<1x78xi1> to vector<1x78xi32>
    %17 = arith.addi %13, %16 : vector<1x78xi32>
    %c40_i32 = arith.constant 40 : i32
    %18 = vector.broadcast %c40_i32 : i32 to vector<1x78xi32>
    %19 = arith.cmpi sge, %4, %18 : vector<1x78xi32>
    %20 = arith.extui %19 : vector<1x78xi1> to vector<1x78xi32>
    %21 = arith.addi %17, %20 : vector<1x78xi32>
    %c50_i32 = arith.constant 50 : i32
    %22 = vector.broadcast %c50_i32 : i32 to vector<1x78xi32>
    %23 = arith.cmpi sge, %4, %22 : vector<1x78xi32>
    %24 = arith.extui %23 : vector<1x78xi1> to vector<1x78xi32>
    %25 = arith.addi %21, %24 : vector<1x78xi32>
    %c60_i32 = arith.constant 60 : i32
    %26 = vector.broadcast %c60_i32 : i32 to vector<1x78xi32>
    %27 = arith.cmpi sge, %4, %26 : vector<1x78xi32>
    %28 = arith.extui %27 : vector<1x78xi1> to vector<1x78xi32>
    %29 = arith.addi %25, %28 : vector<1x78xi32>
    %c70_i32 = arith.constant 70 : i32
    %30 = vector.broadcast %c70_i32 : i32 to vector<1x78xi32>
    %31 = arith.cmpi sge, %4, %30 : vector<1x78xi32>
    %32 = arith.extui %31 : vector<1x78xi1> to vector<1x78xi32>
    %33 = arith.addi %29, %32 : vector<1x78xi32>
    %c10_i32_4 = arith.constant 10 : i32
    %34 = vector.broadcast %c10_i32_4 : i32 to vector<1x78xi32>
    %35 = arith.muli %34, %33 : vector<1x78xi32>
    %36 = arith.subi %4, %35 : vector<1x78xi32>
    %c8_i32 = arith.constant 8 : i32
    %37 = vector.broadcast %c8_i32 : i32 to vector<1x78xi32>
    %38 = arith.cmpi slt, %36, %37 : vector<1x78xi32>
    %39 = arith.extui %38 : vector<1x78xi1> to vector<1x78xi32>
    %40 = arith.sitofp %39 : vector<1x78xi32> to vector<1x78xf32>
    %cst = arith.constant 0.000000e+00 : f32
    %41 = vector.broadcast %cst : f32 to vector<12x1xf32>
    %cst_5 = arith.constant 0.000000e+00 : f32
    %42 = vector.broadcast %cst_5 : f32 to vector<12x1xf32>
    %c0_6 = arith.constant 0 : index
    %c0_7 = arith.constant 0 : index
    %c0_8 = arith.constant 0 : index
    %43 = vector.load %arg0[%c0_6, %c0_7, %c0_8] : memref<1x4x100xf32, #tpu.memory_space<vmem>>, vector<1x4x100xf32>
    %44 = vector.shape_cast %43 : vector<1x4x100xf32> to vector<4x100xf32>
    %45 = vector.extract_strided_slice %44 {offsets = [0, 0], sizes = [4, 78], strides = [1, 1]} : vector<4x100xf32> to vector<4x78xf32>
    %c0_9 = arith.constant 0 : index
    %c0_10 = arith.constant 0 : index
    %46 = vector.load %arg4[%c0_9, %c0_10] : memref<36x78xf32, #tpu.memory_space<vmem>>, vector<4x78xf32>
    tpu.vector_store %arg4[%c0_9, %c0_10], %45 {strides = array<i32>} : memref<36x78xf32, #tpu.memory_space<vmem>>, vector<4x78xf32>,
    %47 = vector.extract_strided_slice %44 {offsets = [0, 1], sizes = [4, 78], strides = [1, 1]} : vector<4x100xf32> to vector<4x78xf32>
    %c4 = arith.constant 4 : index
    %c0_11 = arith.constant 0 : index
    %48 = vector.load %arg4[%c4, %c0_11] : memref<36x78xf32, #tpu.memory_space<vmem>>, vector<4x78xf32>
    tpu.vector_store %arg4[%c4, %c0_11], %47 {strides = array<i32>} : memref<36x78xf32, #tpu.memory_space<vmem>>, vector<4x78xf32>,
    %49 = vector.extract_strided_slice %44 {offsets = [0, 2], sizes = [4, 78], strides = [1, 1]} : vector<4x100xf32> to vector<4x78xf32>
    %c8 = arith.constant 8 : index
    %c0_12 = arith.constant 0 : index
    %50 = vector.load %arg4[%c8, %c0_12] : memref<36x78xf32, #tpu.memory_space<vmem>>, vector<4x78xf32>
    tpu.vector_store %arg4[%c8, %c0_12], %49 {strides = array<i32>} : memref<36x78xf32, #tpu.memory_space<vmem>>, vector<4x78xf32>,
    %51 = vector.extract_strided_slice %44 {offsets = [0, 10], sizes = [4, 78], strides = [1, 1]} : vector<4x100xf32> to vector<4x78xf32>
    %c12 = arith.constant 12 : index
    %c0_13 = arith.constant 0 : index
    %52 = vector.load %arg4[%c12, %c0_13] : memref<36x78xf32, #tpu.memory_space<vmem>>, vector<4x78xf32>
    tpu.vector_store %arg4[%c12, %c0_13], %51 {strides = array<i32>} : memref<36x78xf32, #tpu.memory_space<vmem>>, vector<4x78xf32>,
    %53 = vector.extract_strided_slice %44 {offsets = [0, 11], sizes = [4, 78], strides = [1, 1]} : vector<4x100xf32> to vector<4x78xf32>
    %c16 = arith.constant 16 : index
    %c0_14 = arith.constant 0 : index
    %54 = vector.load %arg4[%c16, %c0_14] : memref<36x78xf32, #tpu.memory_space<vmem>>, vector<4x78xf32>
    tpu.vector_store %arg4[%c16, %c0_14], %53 {strides = array<i32>} : memref<36x78xf32, #tpu.memory_space<vmem>>, vector<4x78xf32>,
    %55 = vector.extract_strided_slice %44 {offsets = [0, 12], sizes = [4, 78], strides = [1, 1]} : vector<4x100xf32> to vector<4x78xf32>
    %c20 = arith.constant 20 : index
    %c0_15 = arith.constant 0 : index
    %56 = vector.load %arg4[%c20, %c0_15] : memref<36x78xf32, #tpu.memory_space<vmem>>, vector<4x78xf32>
    tpu.vector_store %arg4[%c20, %c0_15], %55 {strides = array<i32>} : memref<36x78xf32, #tpu.memory_space<vmem>>, vector<4x78xf32>,
    %57 = vector.extract_strided_slice %44 {offsets = [0, 20], sizes = [4, 78], strides = [1, 1]} : vector<4x100xf32> to vector<4x78xf32>
    %c24 = arith.constant 24 : index
    %c0_16 = arith.constant 0 : index
    %58 = vector.load %arg4[%c24, %c0_16] : memref<36x78xf32, #tpu.memory_space<vmem>>, vector<4x78xf32>
    tpu.vector_store %arg4[%c24, %c0_16], %57 {strides = array<i32>} : memref<36x78xf32, #tpu.memory_space<vmem>>, vector<4x78xf32>,
    %59 = vector.extract_strided_slice %44 {offsets = [0, 21], sizes = [4, 78], strides = [1, 1]} : vector<4x100xf32> to vector<4x78xf32>
    %c28 = arith.constant 28 : index
    %c0_17 = arith.constant 0 : index
    %60 = vector.load %arg4[%c28, %c0_17] : memref<36x78xf32, #tpu.memory_space<vmem>>, vector<4x78xf32>
    tpu.vector_store %arg4[%c28, %c0_17], %59 {strides = array<i32>} : memref<36x78xf32, #tpu.memory_space<vmem>>, vector<4x78xf32>,
    %61 = vector.extract_strided_slice %44 {offsets = [0, 22], sizes = [4, 78], strides = [1, 1]} : vector<4x100xf32> to vector<4x78xf32>
    %c32 = arith.constant 32 : index
    %c0_18 = arith.constant 0 : index
    %62 = vector.load %arg4[%c32, %c0_18] : memref<36x78xf32, #tpu.memory_space<vmem>>, vector<4x78xf32>
    tpu.vector_store %arg4[%c32, %c0_18], %61 {strides = array<i32>} : memref<36x78xf32, #tpu.memory_space<vmem>>, vector<4x78xf32>,
    %c0_19 = arith.constant 0 : index
    %c0_20 = arith.constant 0 : index
    %63 = vector.load %arg1[%c0_19, %c0_20] : memref<12x36xf32, #tpu.memory_space<vmem>>, vector<12x36xf32>
    %c0_21 = arith.constant 0 : index
    %c0_22 = arith.constant 0 : index
    %64 = vector.load %arg4[%c0_21, %c0_22] : memref<36x78xf32, #tpu.memory_space<vmem>>, vector<36x78xf32>
    %cst_23 = arith.constant dense<0.000000e+00> : vector<12x78xf32>
    %65 = tpu.matmul %63, %64, %cst_23 {dimension_numbers = #tpu.dot_dimension_numbers<[1], [0], [0], [1], [0, 0, 1, 1], [], []>} : vector<12x36xf32>, vector<36x78xf32>, vector<12x78xf32> -> vector<12x78xf32>
    %66 = vector.broadcast %0 : vector<12x1xf32> to vector<12x78xf32>
    %67 = arith.addf %65, %66 : vector<12x78xf32>
    %68 = vector.broadcast %1 : vector<12x1xf32> to vector<12x78xf32>
    %69 = arith.subf %67, %68 : vector<12x78xf32>
    %70 = vector.broadcast %40 : vector<1x78xf32> to vector<12x78xf32>
    %71 = arith.mulf %69, %70 : vector<12x78xf32>
    %cst_24 = arith.constant dense<0.000000e+00> : vector<12xf32>
    %72 = vector.multi_reduction <add>, %71, %cst_24 [1] : vector<12x78xf32> to vector<12xf32>
    %73 = vector.shape_cast %72 : vector<12xf32> to vector<12x1xf32>
    %74 = arith.addf %41, %73 : vector<12x1xf32>
    %75 = arith.mulf %71, %71 : vector<12x78xf32>
    %cst_25 = arith.constant dense<0.000000e+00> : vector<12xf32>
    %76 = vector.multi_reduction <add>, %75, %cst_25 [1] : vector<12x78xf32> to vector<12xf32>
    %77 = vector.shape_cast %76 : vector<12xf32> to vector<12x1xf32>
    %78 = arith.addf %42, %77 : vector<12x1xf32>
    %cst_26 = arith.constant 8.771930e-04 : f32
    %79 = vector.broadcast %cst_26 : f32 to vector<12x1xf32>
    %80 = arith.mulf %74, %79 : vector<12x1xf32>
    %cst_27 = arith.constant 8.771930e-04 : f32
    %81 = vector.broadcast %cst_27 : f32 to vector<12x1xf32>
    %82 = arith.mulf %78, %81 : vector<12x1xf32>
    %83 = arith.mulf %80, %80 : vector<12x1xf32>
    %84 = arith.subf %82, %83 : vector<12x1xf32>
    %cst_28 = arith.constant 9.99999974E-6 : f32
    %85 = vector.broadcast %cst_28 : f32 to vector<12x1xf32>
    %86 = arith.addf %84, %85 : vector<12x1xf32>
    %87 = math.rsqrt %86 : vector<12x1xf32>
    %88 = arith.mulf %2, %87 : vector<12x1xf32>
    %89 = arith.addf %1, %80 : vector<12x1xf32>
    %90 = arith.mulf %89, %88 : vector<12x1xf32>
    %91 = arith.subf %3, %90 : vector<12x1xf32>
    %92 = arith.mulf %1, %88 : vector<12x1xf32>
    %93 = arith.addf %92, %91 : vector<12x1xf32>
    %94 = tpu.iota {dimensions = array<i32: 0>} : vector<78x1xi32>
    %c0_i32_29 = arith.constant 0 : i32
    %95 = vector.broadcast %c0_i32_29 : i32 to vector<78x1xi32>
    %c10_i32_30 = arith.constant 10 : i32
    %96 = vector.broadcast %c10_i32_30 : i32 to vector<78x1xi32>
    %97 = arith.cmpi sge, %94, %96 : vector<78x1xi32>
    %98 = arith.extui %97 : vector<78x1xi1> to vector<78x1xi32>
    %99 = arith.addi %95, %98 : vector<78x1xi32>
    %c20_i32_31 = arith.constant 20 : i32
    %100 = vector.broadcast %c20_i32_31 : i32 to vector<78x1xi32>
    %101 = arith.cmpi sge, %94, %100 : vector<78x1xi32>
    %102 = arith.extui %101 : vector<78x1xi1> to vector<78x1xi32>
    %103 = arith.addi %99, %102 : vector<78x1xi32>
    %c30_i32_32 = arith.constant 30 : i32
    %104 = vector.broadcast %c30_i32_32 : i32 to vector<78x1xi32>
    %105 = arith.cmpi sge, %94, %104 : vector<78x1xi32>
    %106 = arith.extui %105 : vector<78x1xi1> to vector<78x1xi32>
    %107 = arith.addi %103, %106 : vector<78x1xi32>
    %c40_i32_33 = arith.constant 40 : i32
    %108 = vector.broadcast %c40_i32_33 : i32 to vector<78x1xi32>
    %109 = arith.cmpi sge, %94, %108 : vector<78x1xi32>
    %110 = arith.extui %109 : vector<78x1xi1> to vector<78x1xi32>
    %111 = arith.addi %107, %110 : vector<78x1xi32>
    %c50_i32_34 = arith.constant 50 : i32
    %112 = vector.broadcast %c50_i32_34 : i32 to vector<78x1xi32>
    %113 = arith.cmpi sge, %94, %112 : vector<78x1xi32>
    %114 = arith.extui %113 : vector<78x1xi1> to vector<78x1xi32>
    %115 = arith.addi %111, %114 : vector<78x1xi32>
    %c60_i32_35 = arith.constant 60 : i32
    %116 = vector.broadcast %c60_i32_35 : i32 to vector<78x1xi32>
    %117 = arith.cmpi sge, %94, %116 : vector<78x1xi32>
    %118 = arith.extui %117 : vector<78x1xi1> to vector<78x1xi32>
    %119 = arith.addi %115, %118 : vector<78x1xi32>
    %c70_i32_36 = arith.constant 70 : i32
    %120 = vector.broadcast %c70_i32_36 : i32 to vector<78x1xi32>
    %121 = arith.cmpi sge, %94, %120 : vector<78x1xi32>
    %122 = arith.extui %121 : vector<78x1xi1> to vector<78x1xi32>
    %123 = arith.addi %119, %122 : vector<78x1xi32>
    %c10_i32_37 = arith.constant 10 : i32
    %124 = vector.broadcast %c10_i32_37 : i32 to vector<78x1xi32>
    %125 = arith.muli %124, %123 : vector<78x1xi32>
    %126 = arith.subi %94, %125 : vector<78x1xi32>
    %c8_i32_38 = arith.constant 8 : i32
    %127 = vector.broadcast %c8_i32_38 : i32 to vector<78x1xi32>
    %128 = arith.cmpi slt, %126, %127 : vector<78x1xi32>
    %c20_i32_39 = arith.constant 20 : i32
    %129 = vector.broadcast %c20_i32_39 : i32 to vector<78x1xi32>
    %130 = arith.addi %129, %123 : vector<78x1xi32>
    %c38_i32 = arith.constant 38 : i32
    %131 = vector.broadcast %c38_i32 : i32 to vector<78x1xi32>
    %132 = arith.muli %130, %131 : vector<78x1xi32>
    %c23_i32 = arith.constant 23 : i32
    %133 = vector.broadcast %c23_i32 : i32 to vector<78x1xi32>
    %134 = arith.addi %132, %133 : vector<78x1xi32>
    %135 = arith.addi %134, %126 : vector<78x1xi32>
    %c-1_i32 = arith.constant -1 : i32
    %136 = vector.broadcast %c-1_i32 : i32 to vector<78x1xi32>
    %137 = arith.select %128, %135, %136 : vector<78x1xi1>, vector<78x1xi32>
    %138 = tpu.iota {dimensions = array<i32: 1>} : vector<78x1140xi32>
    %139 = vector.broadcast %137 : vector<78x1xi32> to vector<78x1140xi32>
    %140 = arith.cmpi eq, %138, %139 : vector<78x1140xi32>
    %141 = arith.extui %140 : vector<78x1140xi1> to vector<78x1140xi32>
    %142 = arith.sitofp %141 : vector<78x1140xi32> to vector<78x1140xf32>
    %143 = vector.broadcast %88 : vector<12x1xf32> to vector<12x78xf32>
    %144 = arith.mulf %67, %143 : vector<12x78xf32>
    %145 = vector.broadcast %91 : vector<12x1xf32> to vector<12x78xf32>
    %146 = arith.addf %144, %145 : vector<12x78xf32>
    %147 = vector.broadcast %93 : vector<12x1xf32> to vector<12x78xf32>
    %148 = arith.subf %146, %147 : vector<12x78xf32>
    %cst_40 = arith.constant dense<0.000000e+00> : vector<12x1140xf32>
    %149 = tpu.matmul %148, %142, %cst_40 {dimension_numbers = #tpu.dot_dimension_numbers<[1], [0], [0], [1], [0, 0, 1, 1], [], []>} : vector<12x78xf32>, vector<78x1140xf32>, vector<12x1140xf32> -> vector<12x1140xf32>
    %150 = vector.broadcast %93 : vector<12x1xf32> to vector<12x1140xf32>
    %151 = arith.addf %149, %150 : vector<12x1140xf32>
    %c0_41 = arith.constant 0 : index
    %c0_42 = arith.constant 0 : index
    %c0_43 = arith.constant 0 : index
    %152 = vector.load %arg3[%c0_41, %c0_42, %c0_43] : memref<1x12x1140xf32, #tpu.memory_space<vmem>>, vector<1x12x1140xf32>
    %153 = vector.shape_cast %152 : vector<1x12x1140xf32> to vector<12x1140xf32>
    %154 = vector.shape_cast %151 : vector<12x1140xf32> to vector<1x12x1140xf32>
    tpu.vector_store %arg3[%c0_41, %c0_42, %c0_43], %154 {strides = array<i32>} : memref<1x12x1140xf32, #tpu.memory_space<vmem>>, vector<1x12x1140xf32>,
    return
  }
}

</mosaic_0001>

<bundles_post_ra>
// kernel: _lambda_.1
= control target key start
LH: loop header
LB: loop body
LE: loop exit
PB: predicated region body
PF: predicated region fallthrough
CT: control target
= control target key end

     0   :  { %vm44_vm0 = vcmask 633856   ;;  %s1551_s14 = smov 106   ;;  %s1552_s15 = smov 107   ;;  %vm96_vm1 = vcmask 293888   ;;  %v1559_v2 = vmov 1   ;;  %v1560_v4 = vmov 0   ;;  %s2126_s0 = inlined_call_operand.vmem [shape: f32[1,4,100], index: 0, kind: input, shape index: {}]   ;;  %s2127_s1 = inlined_call_operand.vmem [shape: f32[12,36], index: 1, kind: input, shape index: {}]   ;;  %s2128_s2 = inlined_call_operand.vmem [shape: f32[12,4], index: 2, kind: input, shape index: {}]   ;;  %s2129_s3 = inlined_call_operand.vmem [shape: f32[1,12,1140], index: 3, kind: output, shape index: {}]  }
   0x1   :  { %v43_v0 = vld [vmem:[%s2126_s0] sm:$0xf]  ;;  %s1553_s16 = smov 108   ;;  %s1554_s17 = smov 117   ;;  %1539 = vset.pattern.permute.xlu1 %v1559_v2  ;;  %1538 = vset.pattern.permute.xlu0 %v1560_v4  ;;  %v1608_v5 = vld [vmem:[%s2128_s2 + $0x8] sm:$0xf]  ;;  %v16_v21 = vlaneseq }
   0x2   :  { %75 = vrot.lane.b32.xlu0 %v43_v0, %s1551_s14  ;;  %71 = vrot.lane.b32.xlu1 %v43_v0, %s1552_s15  ;;  %45 = vst.msk [vmem:[#allocation2] sm:$0xf] %vm44_vm0, %v43_v0  ;;  %s1555_s18 = smov 116   ;;  %s1556_s19 = smov 126   ;;  %v79_v1 = vld [vmem:[%s2127_s1] sm:$0xff]  ;;  %vm103_vm2 = vcmask 1043456  }
   0x3   :  { %1497 = vmatprep.mubr.msk.f32.mxu0 %vm96_vm1, %v79_v1  ;;  %s1557_s0 = smov 118   ;;  %s1558_s22 = smov 127   ;;  %v1600_v3 = vld [vmem:[%s2128_s2] sm:$0xff]  ;;  %v80_v19 = vld [vmem:[%s2127_s1 + $0x8] sm:$0xf]  ;;  %v1561_v20 = vmov 0.0  }
   0x4   :  { %960 = vmatprep.mubr.f32.mxu1 %v1561_v20  ;;  %v1629_v22 = vand.u32 127, %v16_v21  ;;  %vm194_vm11 = vcmask 637952   ;;  %s1564_s1 = smov 2   ;;  %vm868_vm12 = vcmask 1045504  }
   0x6   :  { %67 = vrot.lane.b32.xlu0 %v43_v0, %s1553_s16  ;;  %59 = vrot.lane.b32.xlu1 %v43_v0, %s1554_s17  ;;  %vm18_vm3 = vcmp.ge.s32.totalorder %v1629_v22, 10  ;;  %vm20_vm4 = vcmp.ge.s32.totalorder %v1629_v22, 20  ;;  %vm23_vm5 = vcmp.ge.s32.totalorder %v1629_v22, 30  ;;  %vm26_vm6 = vcmp.ge.s32.totalorder %v1629_v22, 40 }
   0x7   :  { %v19_v23 = vsel %vm18_vm3, 1, %v1560_v4  ;;  %v21_v24 = vsel %vm20_vm4, 1, %v1560_v4  ;;  %v24_v26 = vsel %vm23_vm5, 1, %v1560_v4  ;;  %v27_v28 = vsel %vm26_vm6, 1, %v1560_v4 }
   0x8   :  { %v22_v25 = vadd.s32 %v21_v24, %v19_v23  ;;  %vm29_vm7 = vcmp.ge.s32.totalorder %v1629_v22, 50  ;;  %vm32_vm8 = vcmp.ge.s32.totalorder %v1629_v22, 60  ;;  %vm35_vm9 = vcmp.ge.s32.totalorder %v1629_v22, 70 }
   0x9   :  { %v30_v30 = vsel %vm29_vm7, 1, %v1560_v4  ;;  %v33_v32 = vsel %vm32_vm8, 1, %v1560_v4  ;;  %v36_v34 = vsel %vm35_vm9, 1, %v1560_v4 }
   0xa   :  { %63 = vrot.lane.b32.xlu0 %v43_v0, %s1555_s18  ;;  %51 = vrot.lane.b32.xlu1 %v43_v0, %s1556_s19  ;;  %v25_v27 = vadd.s32 %v24_v26, %v22_v25 }
   0xc   :  { %v28_v29 = vadd.s32 %v27_v28, %v25_v27 }
   0xe   :  { %55 = vrot.lane.b32.xlu0 %v43_v0, %s1557_s0  ;;  %47 = vrot.lane.b32.xlu1 %v43_v0, %s1558_s22  ;;  %v31_v31 = vadd.s32 %v30_v30, %v28_v29  ;;  %v1678_v30 = vshrl.u32 %v16_v21, 7 }
  0x10   :  { %v34_v33 = vadd.s32 %v33_v32, %v31_v31  ;;  %v1681_v31 = vadd.s32 128, %v1629_v22  ;;  %v271_v32 = vadd.s32 72, %v1678_v30  ;;  %v266_v21 = vadd.s32 32, %v1678_v30 }
  0x12   :  { %183 = vperm.xlu1 %1539, %v1600_v3   ;;  %88 = vperm.xlu0 %1538, %v1600_v3   ;;  %v37_v35 = vadd.s32 %v36_v34, %v34_v33  ;;  %v270_v33 = vadd.s32 64, %v1678_v30  ;;  %v269_v34 = vadd.s32 56, %v1678_v30 }
  0x14   :  { %v38_v37 = vmul.u32 10, %v37_v35  ;;  %v268_v35 = vadd.s32 48, %v1678_v30  ;;  %vm450_vm13 = vcmp.ge.s32.totalorder %v270_v33, 70  ;;  %vm419_vm14 = vcmp.ge.s32.totalorder %v269_v34, 60 }
  0x16   :  { %1540 = vset.pattern.permute.xlu1 %v1560_v4  ;;  %1541 = vset.pattern.permute.xlu0 %v1559_v2  ;;  %v39_v39 = vsub.s32 %v1629_v22, %v38_v37  ;;  %v1691_v37 = vadd.s32 256, %v1629_v22  ;;  %vm388_vm15 = vcmp.ge.s32.totalorder %v268_v35, 50 }
  0x17   :  { %93 = vperm.xlu1 %1540, %v1608_v5   ;;  %187 = vperm.xlu0 %1541, %v1608_v5  }
  0x18   :  { %vm40_vm10 = vcmp.lt.s32.totalorder %v39_v39, 8  ;;  %v1309_v39 = vadd.s32 4294967226, %v271_v32 }
  0x19   :  { %v1303_v47 = vsel %vm40_vm10, 1.0, %v1561_v20 }
  0x74   :  { %v76_v6 = vpop.permute.xlu0 %75  ;;  %v72_v7 = vpop.permute.xlu1 %71 }
  0x75   :  { %78 = vst.msk [vmem:[#allocation2 + $0x20] sm:$0xf] %vm44_vm0, %v76_v6  ;;  %74 = vst.msk [vmem:[#allocation2 + $0x1c] sm:$0xf] %vm44_vm0, %v72_v7 }
  0x78   :  { %v68_v8 = vpop.permute.xlu0 %67  ;;  %v60_v9 = vpop.permute.xlu1 %59 }
  0x79   :  { %70 = vst.msk [vmem:[#allocation2 + $0x18] sm:$0xf] %vm44_vm0, %v68_v8  ;;  %62 = vst.msk [vmem:[#allocation2 + $0x10] sm:$0xf] %vm44_vm0, %v60_v9 }
  0x7c   :  { %v64_v10 = vpop.permute.xlu0 %63  ;;  %v85_v11 = vld [vmem:[#allocation2 + $0x20] sm:$0xf]  ;;  %v52_v12 = vpop.permute.xlu1 %51 }
  0x7d   :  { %66 = vst.msk [vmem:[#allocation2 + $0x14] sm:$0xf] %vm44_vm0, %v64_v10  ;;  %1487 = vmatprep.subr.msk.mxu0 %vm103_vm2, %v85_v11  ;;  %54 = vst.msk [vmem:[#allocation2 + $0x8] sm:$0xf] %vm44_vm0, %v52_v12 }
  0x7e   :  { %1488 = vmatpush3.msk.msra.mxu0 %vm103_vm2, %v85_v11 }
  0x80   :  { %v56_v13 = vpop.permute.xlu0 %55  ;;  %v84_v14 = vld [vmem:[#allocation2 + $0x18] sm:$0xff]  ;;  %v48_v15 = vpop.permute.xlu1 %47 }
  0x81   :  { %58 = vst.msk [vmem:[#allocation2 + $0xc] sm:$0xf] %vm44_vm0, %v56_v13  ;;  %1489 = vmatprep.subr.mxu0 %v84_v14  ;;  %50 = vst.msk [vmem:[#allocation2 + $0x4] sm:$0xf] %vm44_vm0, %v48_v15  ;;  %v1562_v15 = vmov 2  }
  0x82   :  { %1490 = vmatpush3.msra.mxu0 %v84_v14  ;;  %1542 = vset.pattern.permute.xlu0 %v1562_v15 }
  0x84   :  { %v83_v16 = vld [vmem:[#allocation2 + $0x10] sm:$0xff] }
  0x85   :  { %1491 = vmatprep.subr.mxu0 %v83_v16 }
  0x86   :  { %1492 = vmatpush3.msra.mxu0 %v83_v16  ;;  %v1563_v16 = vmov 3  }
  0x87   :  { %1543 = vset.pattern.permute.xlu1 %v1563_v16 }
  0x88   :  { %v82_v17 = vld [vmem:[#allocation2 + $0x8] sm:$0xff]  ;;  %v81_v18 = vld [vmem:[#allocation2] sm:$0xff] }
  0x89   :  { %1493 = vmatprep.subr.mxu0 %v82_v17 }
  0x8a   :  { %1494 = vmatpush3.msra.mxu0 %v82_v17 }
  0x8b   :  { %1495 = vmatprep.subr.mxu0 %v81_v18 }
  0x8c   :  { %1496 = vmatpush3.msra.mxu0 %v81_v18 }
  0x8d   :  { %1498 = vmatmul.mubr.msk.f32.vlgmr.msra.gmra.mxu0 %vm96_vm1, %v80_v19  ;;  %v184_v36 = vpop.permute.xlu1 %183  ;;  %v89_v38 = vpop.permute.xlu0 %88 }
  0x8e   :  { %1037 = vmatprep.mubr.f32.mxu0 %v1561_v20 }
  0x92   :  { %v94_v40 = vpop.permute.xlu1 %93  ;;  %v188_v42 = vpop.permute.xlu0 %187 }
 0x14d   :  { %v1499_v41 = vpop.f32.mrf.mxu0 }
 0x14e   :  { %v1646_v43 = vadd.f32 %v1499_v41, %v94_v40  ;;  %v460_v40 = vsel %vm450_vm13, 1, %v1560_v4  ;;  %v429_v41 = vsel %vm419_vm14, 1, %v1560_v4 }
 0x14f   :  { %v173_v44 = vpop.f32.mrf.mxu0 }
 0x150   :  { %v191_v45 = vsub.f32 %v1646_v43, %v188_v42  ;;  %v1649_v46 = vadd.f32 %v173_v44, %v89_v38  ;;  %v1695_v38 = vadd.s32 24, %v1678_v30  ;;  %v398_v42 = vsel %vm388_vm15, 1, %v1560_v4 }
 0x151   :  { %v1307_v44 = vadd.s32 4294967266, %v266_v21 }
 0x152   :  { %v190_v48 = vsub.f32 %v1649_v46, %v184_v36  ;;  %v193_v50 = vmul.f32 %v1303_v47, %v191_v45  ;;  %v1688_v36 = vadd.s32 384, %v1629_v22  ;;  %v541_v45 = vadd.s32 1049, %v1309_v39 }
 0x153   :  { %vm496_vm1 = vcmp.lt.s32.totalorder %v1307_v44, 8  ;;  %vm325_vm2 = vcmp.ge.s32.totalorder %v1695_v38, 30 }
 0x154   :  { %v192_v49 = vmul.f32 %v1303_v47, %v190_v48  ;;  %v204_v54 = vmul.f32 %v193_v50, %v193_v50  ;;  %v198_v55 = vsel %vm44_vm0, %v193_v50, 0.0  ;;  %v470_v47 = vadd.s32 6, %v460_v40 }
 0x155   :  { %v439_v48 = vadd.s32 5, %v429_v41  ;;  %v536_v50 = vadd.s32 897, %v1307_v44 }
 0x156   :  { %v195_v51 = vsel %vm194_vm11, %v192_v49, 0.0  ;;  %v203_v52 = vmul.f32 %v192_v49, %v192_v49  ;;  %v208_v56 = vsel %vm44_vm0, %v204_v54, 0.0  ;;  %vm501_vm0 = vcmp.lt.s32.totalorder %v1309_v39, 8 }
 0x157   :  { %196 = vadd.xlane.f32.xlu1 %v195_v51  ;;  %v408_v49 = vadd.s32 4, %v398_v42  ;;  %v1703_v51 = vsel %vm501_vm0, %v541_v45, 4294967295  ;;  %v479_v54 = vmul.u32 10, %v439_v48 }
 0x158   :  { %v205_v53 = vsel %vm194_vm11, %v203_v52, 0.0  ;;  %v480_v52 = vmul.u32 10, %v470_v47  ;;  %vm642_vm3 = vcmp.eq.s32.totalorder %v1681_v31, %v1703_v51  ;;  %vm644_vm4 = vcmp.eq.s32.totalorder %v1688_v36, %v1703_v51 }
 0x159   :  { %206 = vadd.xlane.f32.xlu0 %v205_v53  ;;  %v510_v53 = vadd.s32 20, %v470_v47  ;;  %vm641_vm5 = vcmp.eq.s32.totalorder %v1629_v22, %v1703_v51  ;;  %vm643_vm6 = vcmp.eq.s32.totalorder %v1691_v37, %v1703_v51 }
 0x15b   :  { %199 = vadd.xlane.f32.xlu1 %v198_v55  ;;  %v1376_v55 = vsel %vm642_vm3, 1.0, %v1561_v20 }
 0x15c   :  { %1384 = vmatprep.subr.msk.mxu1 %vm868_vm12, %v1376_v55 }
 0x15d   :  { %209 = vadd.xlane.f32.xlu0 %v208_v56  ;;  %v1375_v56 = vsel %vm641_vm5, 1.0, %v1561_v20 }
 0x15e   :  { %1385 = vmatpush1.msk.msra.mxu1 %vm868_vm12, %v1375_v56 }
 0x1e0   :  { %v197_v57 = vpop.xlane.xlu1 %196 }
 0x1e1   :  { %v213_v58 = vmul.f32 0.000877193, %v197_v57  ;;  %v1377_v57 = vsel %vm643_vm6, 1.0, %v1561_v20 }
 0x1e2   :  { %v207_v59 = vpop.xlane.xlu0 %206 }
 0x1e3   :  { %v217_v60 = vmul.f32 %v213_v58, %v213_v58  ;;  %v215_v61 = vmul.f32 0.000877193, %v207_v59  ;;  %v227_v17 = vadd.f32 %v213_v58, %v1600_v3  ;;  %v490_v58 = vsub.s32 %v270_v33, %v480_v52 }
 0x1e4   :  { %v200_v62 = vpop.xlane.xlu1 %199  ;;  %v520_v59 = vmul.u32 38, %v510_v53 }
 0x1e5   :  { %v219_v63 = vsub.f32 %v215_v61, %v217_v60  ;;  %v214_v0 = vmul.f32 0.000877193, %v200_v62  ;;  %v489_v60 = vsub.s32 %v269_v34, %v479_v54  ;;  %v509_v61 = vadd.s32 20, %v439_v48 }
 0x1e6   :  { %v210_v1 = vpop.xlane.xlu0 %209  ;;  %v478_v62 = vmul.u32 10, %v408_v49  ;;  %vm500_vm7 = vcmp.lt.s32.totalorder %v490_v58, 8 }
 0x1e7   :  { %v221_v6 = vadd.f32 1e-05, %v219_v63  ;;  %v218_v7 = vmul.f32 %v214_v0, %v214_v0  ;;  %v216_v8 = vmul.f32 0.000877193, %v210_v1  ;;  %v228_v23 = vadd.f32 %v214_v0, %v1608_v5 }
 0x1e8   :  { %v508_v63 = vadd.s32 20, %v408_v49  ;;  %v264_v0 = vadd.s32 16, %v1678_v30  ;;  %v1723_v1 = vadd.s32 8, %v1678_v30  ;;  %vm499_vm8 = vcmp.lt.s32.totalorder %v489_v60, 8 }
 0x1e9   :  { %1547 = vrsqrt.f32 %v221_v6  ;;  %v220_v9 = vsub.f32 %v216_v8, %v218_v7  ;;  %v530_v6 = vadd.s32 23, %v520_v59  ;;  %v519_v7 = vmul.u32 38, %v509_v61 }
 0x1ea   :  { %v1726_v8 = vsel %vm496_vm1, %v536_v50, 4294967295  ;;  %vm294_vm14 = vcmp.ge.s32.totalorder %v264_v0, 20  ;;  %vm273_vm15 = vcmp.ge.s32.totalorder %v1723_v1, 10 }
 0x1eb   :  { %v222_v10 = vadd.f32 1e-05, %v220_v9  ;;  %v335_v9 = vsel %vm325_vm2, 1, %v1560_v4  ;;  %vm597_vm10 = vcmp.eq.s32.totalorder %v1681_v31, %v1726_v8  ;;  %vm599_vm13 = vcmp.eq.s32.totalorder %v1688_v36, %v1726_v8 }
 0x1ec   :  { %v345_v15 = vadd.s32 2, %v335_v9  ;;  %v283_v42 = vsel %vm273_vm15, 1, %v1560_v4 }
 0x1ed   :  { %1549 = vrsqrt.f32 %v222_v10  ;;  %v488_v10 = vsub.s32 %v268_v35, %v478_v62  ;;  %v473_v47 = vmul.u32 10, %v283_v42  ;;  %v503_v48 = vadd.s32 20, %v283_v42 }
 0x1ee   :  { %v505_v32 = vadd.s32 20, %v345_v15 }
 0x1ef   :  { %vm498_vm9 = vcmp.lt.s32.totalorder %v488_v10, 8  ;;  %v483_v50 = vsub.s32 %v1723_v1, %v473_v47  ;;  %v513_v52 = vmul.u32 38, %v503_v48 }
 0x1f0   :  { %v515_v21 = vmul.u32 38, %v505_v32 }
 0x1f1   :  { %v523_v54 = vadd.s32 23, %v513_v52 }
 0x1f6   :  { %v1548_v11 = vpop.eup %1547 }
 0x1f7   :  { %v225_v12 = vmul.f32 %v1548_v11, %v1600_v3  ;;  %v518_v11 = vmul.u32 38, %v508_v63 }
 0x1f9   :  { %231 = vrot.lane.b32.xlu1 %v225_v12, %s1558_s22 }
 0x1fa   :  { %v1550_v13 = vpop.eup %1549 }
 0x1fb   :  { %v226_v14 = vmul.f32 %v1550_v13, %v1608_v5  ;;  %v529_v13 = vadd.s32 23, %v519_v7 }
 0x1fd   :  { %233 = vrot.lane.b32.xlu0 %v226_v14, %s1558_s22 }
 0x26b   :  { %v1663_v18 = vpop.permute.xlu1 %231 }
 0x26c   :  { %v237_v19 = vmul.f32 %v1663_v18, %v227_v17 }
 0x26e   :  { %241 = vrot.lane.b32.xlu1 %v237_v19, %s1564_s1  ;;  %v539_v19 = vadd.s32 %v529_v13, %v489_v60 }
 0x26f   :  { %v1667_v24 = vpop.permute.xlu0 %233 }
 0x270   :  { %v238_v25 = vmul.f32 %v1667_v24, %v228_v23  ;;  %v304_v23 = vsel %vm294_vm14, 1, %v1560_v4  ;;  %v250_v61 = vmul.f32 %v1667_v24, %v1608_v5 }
 0x271   :  { %v314_v33 = vadd.s32 1, %v304_v23  ;;  %v532_v23 = vadd.s32 783, %v1678_v30 }
 0x272   :  { %243 = vrot.lane.b32.xlu1 %v238_v25, %s1564_s1  ;;  %v1565_v25 = vmov 1.0  }
 0x273   :  { %v474_v39 = vmul.u32 10, %v314_v33  ;;  %v504_v40 = vadd.s32 20, %v314_v33 }
 0x275   :  { %v484_v41 = vsub.s32 %v264_v0, %v474_v39  ;;  %v514_v45 = vmul.u32 38, %v504_v40  ;;  %v1880_v0 = vadd.s32 768, %v1629_v22 }
 0x277   :  { %v524_v49 = vadd.s32 23, %v514_v45 }
 0x279   :  { %v534_v53 = vadd.s32 %v524_v49, %v484_v41 }
 0x2e0   :  { %v242_v26 = vpop.permute.xlu1 %241 }
 0x2e1   :  { %v247_v27 = vsub.f32 %v1600_v3, %v242_v26  ;;  %v1750_v26 = vsel %vm499_vm8, %v539_v19, 4294967295  ;;  %v559_v19 = vadd.s32 1024, %v1629_v22 }
 0x2e2   :  { %vm626_vm5 = vcmp.eq.s32.totalorder %v1688_v36, %v1750_v26  ;;  %vm623_vm6 = vcmp.eq.s32.totalorder %v1629_v22, %v1750_v26 }
 0x2e3   :  { %253 = vrot.lane.b32.xlu0 %v247_v27, %s1556_s19 }
 0x2e4   :  { %v244_v28 = vpop.permute.xlu1 %243 }
 0x2e5   :  { %v1673_v29 = vsub.f32 %v1608_v5, %v244_v28  ;;  %v475_v28 = vmul.u32 10, %v345_v15  ;;  %v267_v5 = vadd.s32 40, %v1678_v30 }
 0x2e7   :  { %831 = vperm.xlu0 %1542, %v225_v12   ;;  %255 = vrot.lane.b32.xlu1 %v1673_v29, %s1556_s19  ;;  %v540_v12 = vadd.s32 %v530_v6, %v490_v58  ;;  %v485_v35 = vsub.s32 %v1695_v38, %v475_v28  ;;  %v525_v38 = vadd.s32 23, %v515_v21 }
 0x2e9   :  { %v1735_v17 = vsel %vm500_vm7, %v540_v12, 4294967295  ;;  %vm625_vm7 = vcmp.eq.s32.totalorder %v1691_v37, %v1750_v26  ;;  %v535_v44 = vadd.s32 %v525_v38, %v485_v35 }
 0x2ea   :  { %vm633_vm0 = vcmp.eq.s32.totalorder %v1681_v31, %v1735_v17  ;;  %vm635_vm1 = vcmp.eq.s32.totalorder %v1688_v36, %v1735_v17  ;;  %vm632_vm2 = vcmp.eq.s32.totalorder %v1629_v22, %v1735_v17  ;;  %vm634_vm3 = vcmp.eq.s32.totalorder %v1691_v37, %v1735_v17 }
 0x2eb   :  { %835 = vperm.xlu0 %1542, %v226_v14   ;;  %841 = vperm.xlu1 %1543, %v247_v27   ;;  %v528_v14 = vadd.s32 23, %v518_v11 }
 0x2ec   :  { %1386 = vmatprep.subr.msk.mxu1 %vm633_vm0, %v1565_v25 }
 0x2ed   :  { %v538_v27 = vadd.s32 %v528_v14, %v488_v10  ;;  %1387 = vmatpush1.msk.msra.mxu1 %vm632_vm2, %v1565_v25  ;;  %vm598_vm2 = vcmp.eq.s32.totalorder %v1691_v37, %v1726_v8 }
 0x2ef   :  { %1544 = vset.pattern.permute.xlu1 %v1559_v2  ;;  %1546 = vset.pattern.permute.xlu0 %v1559_v2  ;;  %v1378_v2 = vsel %vm644_vm4, 1.0, %v1561_v20  ;;  %vm624_vm4 = vcmp.eq.s32.totalorder %v1681_v31, %v1750_v26  ;;  %v1765_v34 = vsel %vm498_vm9, %v538_v27, 4294967295 }
 0x2f0   :  { %1402 = vmatprep.subr.msk.mxu0 %vm868_vm12, %v1378_v2  ;;  %1388 = vmatprep.subr.msk.mxu1 %vm624_vm4, %v1565_v25  ;;  %vm615_vm8 = vcmp.eq.s32.totalorder %v1681_v31, %v1765_v34  ;;  %vm617_vm14 = vcmp.eq.s32.totalorder %v1688_v36, %v1765_v34  ;;  %vm614_vm0 = vcmp.eq.s32.totalorder %v1629_v22, %v1765_v34  ;;  %vm494_vm4 = vcmp.lt.s32.totalorder %v484_v41, 8 }
 0x2f1   :  { %1403 = vmatpush1.msk.msra.mxu0 %vm868_vm12, %v1377_v57  ;;  %1389 = vmatpush1.msk.msra.mxu1 %vm623_vm6, %v1565_v25  ;;  %vm616_vm9 = vcmp.eq.s32.totalorder %v1691_v37, %v1765_v34  ;;  %vm493_vm6 = vcmp.lt.s32.totalorder %v483_v50, 8  ;;  %v1824_v55 = vsel %vm494_vm4, %v534_v53, 4294967295  ;;  %v533_v2 = vadd.s32 %v523_v54, %v483_v50 }
 0x2f2   :  { %1404 = vmatprep.subr.msk.mxu0 %vm635_vm1, %v1565_v25  ;;  %1390 = vmatprep.subr.msk.mxu1 %vm615_vm8, %v1565_v25  ;;  %vm596_vm1 = vcmp.eq.s32.totalorder %v1629_v22, %v1726_v8  ;;  %vm581_vm8 = vcmp.eq.s32.totalorder %v1688_v36, %v1824_v55  ;;  %vm647_vm4 = vcmp.eq.s32.totalorder %v1880_v0, %v1703_v51 }
 0x2f3   :  { %1405 = vmatpush1.msk.msra.mxu0 %vm634_vm3, %v1565_v25  ;;  %1391 = vmatpush1.msk.msra.mxu1 %vm614_vm0, %v1565_v25  ;;  %vm495_vm3 = vcmp.lt.s32.totalorder %v485_v35, 8  ;;  %vm580_vm0 = vcmp.eq.s32.totalorder %v1691_v37, %v1824_v55  ;;  %v1836_v56 = vsel %vm493_vm6, %v533_v2, 4294967295  ;;  %v1381_v10 = vsel %vm647_vm4, 1.0, %v1561_v20 }
 0x2f4   :  { %1406 = vmatprep.subr.msk.mxu0 %vm626_vm5, %v1565_v25  ;;  %916 = vmatprep.subr.mxu1 %v1561_v20  ;;  %v1801_v4 = vsel %vm495_vm3, %v535_v44, 4294967295  ;;  %vm571_vm3 = vcmp.eq.s32.totalorder %v1691_v37, %v1836_v56 }
 0x2f5   :  { %1407 = vmatpush1.msk.msra.mxu0 %vm625_vm7, %v1565_v25  ;;  %917 = vmatpush1.msra.mxu1 %v1561_v20  ;;  %vm587_vm15 = vcmp.eq.s32.totalorder %v1629_v22, %v1801_v4  ;;  %vm589_vm5 = vcmp.eq.s32.totalorder %v1691_v37, %v1801_v4  ;;  %vm579_vm7 = vcmp.eq.s32.totalorder %v1681_v31, %v1824_v55 }
 0x2f6   :  { %1408 = vmatprep.subr.msk.mxu0 %vm617_vm14, %v1565_v25  ;;  %1392 = vmatprep.subr.msk.mxu1 %vm597_vm10, %v1565_v25  ;;  %vm588_vm10 = vcmp.eq.s32.totalorder %v1681_v31, %v1801_v4  ;;  %vm578_vm14 = vcmp.eq.s32.totalorder %v1629_v22, %v1824_v55  ;;  %v249_v37 = vmul.f32 %v1663_v18, %v1600_v3  ;;  %v1877_v18 = vadd.s32 512, %v1629_v22 }
 0x2f7   :  { %1409 = vmatpush1.msk.msra.mxu0 %vm616_vm9, %v1565_v25  ;;  %1393 = vmatpush1.msk.msra.mxu1 %vm596_vm1, %v1565_v25  ;;  %vm570_vm9 = vcmp.eq.s32.totalorder %v1681_v31, %v1836_v56  ;;  %vm572_vm1 = vcmp.eq.s32.totalorder %v1688_v36, %v1836_v56  ;;  %v1857_v31 = vadd.s32 640, %v1629_v22 }
 0x2f8   :  { %993 = vmatprep.subr.mxu0 %v1561_v20  ;;  %1394 = vmatprep.subr.msk.mxu1 %vm588_vm10, %v1565_v25 }
 0x2f9   :  { %994 = vmatpush1.msra.mxu0 %v1561_v20  ;;  %1395 = vmatpush1.msk.msra.mxu1 %vm587_vm15, %v1565_v25  ;;  %vm646_vm10 = vcmp.eq.s32.totalorder %v1857_v31, %v1703_v51  ;;  %vm645_vm15 = vcmp.eq.s32.totalorder %v1877_v18, %v1703_v51  ;;  %vm601_vm4 = vcmp.eq.s32.totalorder %v1857_v31, %v1726_v8 }
 0x2fa   :  { %1410 = vmatprep.subr.msk.mxu0 %vm599_vm13, %v1565_v25  ;;  %vm590_vm13 = vcmp.eq.s32.totalorder %v1688_v36, %v1801_v4  ;;  %1396 = vmatprep.subr.msk.mxu1 %vm579_vm7, %v1565_v25  ;;  %v1860_v36 = vadd.s32 896, %v1629_v22  ;;  %v1380_v57 = vsel %vm646_vm10, 1.0, %v1561_v20  ;;  %v1379_v9 = vsel %vm645_vm15, 1.0, %v1561_v20 }
 0x2fb   :  { %1411 = vmatpush1.msk.msra.mxu0 %vm598_vm2, %v1565_v25  ;;  %1397 = vmatpush1.msk.msra.mxu1 %vm578_vm14, %v1565_v25  ;;  %vm569_vm2 = vcmp.eq.s32.totalorder %v1629_v22, %v1836_v56  ;;  %vm636_vm7 = vcmp.eq.s32.totalorder %v1877_v18, %v1735_v17  ;;  %vm628_vm14 = vcmp.eq.s32.totalorder %v1857_v31, %v1750_v26 }
 0x2fc   :  { %1412 = vmatprep.subr.msk.mxu0 %vm590_vm13, %v1565_v25  ;;  %1398 = vmatprep.subr.msk.mxu1 %vm570_vm9, %v1565_v25  ;;  %vm648_vm13 = vcmp.eq.s32.totalorder %v1860_v36, %v1703_v51  ;;  %vm639_vm6 = vcmp.eq.s32.totalorder %v1860_v36, %v1735_v17  ;;  %vm627_vm9 = vcmp.eq.s32.totalorder %v1877_v18, %v1750_v26 }
 0x2fd   :  { %1413 = vmatpush1.msk.msra.mxu0 %vm589_vm5, %v1565_v25  ;;  %1399 = vmatpush1.msk.msra.mxu1 %vm569_vm2, %v1565_v25  ;;  %v1382_v58 = vsel %vm648_vm13, 1.0, %v1561_v20  ;;  %vm637_vm5 = vcmp.eq.s32.totalorder %v1857_v31, %v1735_v17  ;;  %vm619_vm2 = vcmp.eq.s32.totalorder %v1857_v31, %v1765_v34  ;;  %vm618_vm10 = vcmp.eq.s32.totalorder %v1877_v18, %v1765_v34 }
 0x2fe   :  { %1414 = vmatprep.subr.msk.mxu0 %vm581_vm8, %v1565_v25  ;;  %926 = vmatprep.subr.mxu1 %v1561_v20  ;;  %vm638_vm8 = vcmp.eq.s32.totalorder %v1880_v0, %v1735_v17  ;;  %vm620_vm13 = vcmp.eq.s32.totalorder %v1880_v0, %v1765_v34 }
 0x2ff   :  { %1415 = vmatpush1.msk.msra.mxu0 %vm580_vm0, %v1565_v25  ;;  %927 = vmatpush1.msra.mxu1 %v1561_v20  ;;  %vm630_vm0 = vcmp.eq.s32.totalorder %v1860_v36, %v1750_v26 }
 0x300   :  { %1416 = vmatprep.subr.msk.mxu0 %vm572_vm1, %v1565_v25  ;;  %1420 = vmatprep.subr.msk.mxu1 %vm868_vm12, %v1380_v57  ;;  %vm629_vm1 = vcmp.eq.s32.totalorder %v1880_v0, %v1750_v26 }
 0x301   :  { %1417 = vmatpush1.msk.msra.mxu0 %vm571_vm3, %v1565_v25  ;;  %vm621_vm3 = vcmp.eq.s32.totalorder %v1860_v36, %v1765_v34 }
 0x302   :  { %1003 = vmatprep.subr.mxu0 %v1561_v20 }
 0x303   :  { %1004 = vmatpush1.msra.mxu0 %v1561_v20 }
 0x304   :  { %1438 = vmatprep.subr.msk.mxu0 %vm868_vm12, %v1382_v58 }
 0x355   :  { %v254_v59 = vpop.permute.xlu0 %253 }
 0x356   :  { %v259_v60 = vadd.f32 %v254_v59, %v249_v37 }
 0x358   :  { %852 = vperm.xlu1 %1544, %v259_v60  }
 0x359   :  { %v256_v62 = vpop.permute.xlu1 %255 }
 0x35a   :  { %v260_v63 = vadd.f32 %v256_v62, %v250_v61 }
 0x35c   :  { %1545 = vset.pattern.permute.xlu1 %v1563_v16  ;;  %857 = vperm.xlu0 %1546, %v260_v63  }
 0x35d   :  { %845 = vperm.xlu1 %1545, %v1673_v29  }
 0x362   :  { %v832_v3 = vpop.permute.xlu0 %831 }
 0x363   :  { %v838_v6 = vmul.f32 %v832_v3, %v1649_v46  ;;  %v1308_v46 = vadd.s32 4294967256, %v267_v5 }
 0x365   :  { %v537_v13 = vadd.s32 935, %v1308_v46 }
 0x366   :  { %v842_v1 = vpop.permute.xlu1 %841  ;;  %v836_v29 = vpop.permute.xlu0 %835 }
 0x367   :  { %v848_v16 = vadd.f32 %v842_v1, %v838_v6  ;;  %v839_v11 = vmul.f32 %v836_v29, %v1646_v43  ;;  %vm612_vm15 = vcmp.eq.s32.totalorder %v1860_v36, %v537_v13 }
 0x3d3   :  { %v1888_v24 = vpop.permute.xlu1 %852 }
 0x3d4   :  { %v1891_v7 = vsub.f32 %v848_v16, %v1888_v24 }
 0x3d6   :  { %1400 = vmatmul.mubr.msk.f32.vlgmr.msra.gmra.mxu1 %vm194_vm11, %v1891_v7  ;;  %1418 = vmatmul.mubr.msk.f32.vlgmr.msra.gmra.mxu0 %vm194_vm11, %v1891_v7 }
 0x3d7   :  { %1421 = vmatpush1.msk.msra.mxu1 %vm868_vm12, %v1379_v9  ;;  %1439 = vmatpush1.msk.msra.mxu0 %vm868_vm12, %v1381_v10  ;;  %v1926_v14 = vpop.permute.xlu0 %857 }
 0x3d8   :  { %1422 = vmatprep.subr.msk.mxu1 %vm637_vm5, %v1565_v25  ;;  %1440 = vmatprep.subr.msk.mxu0 %vm639_vm6, %v1565_v25  ;;  %v846_v12 = vpop.permute.xlu1 %845  ;;  %vm603_vm5 = vcmp.eq.s32.totalorder %v1860_v36, %v1726_v8  ;;  %vm600_vm6 = vcmp.eq.s32.totalorder %v1877_v18, %v1726_v8 }
 0x3d9   :  { %1423 = vmatpush1.msk.msra.mxu1 %vm636_vm7, %v1565_v25  ;;  %1441 = vmatpush1.msk.msra.mxu0 %vm638_vm8, %v1565_v25  ;;  %v849_v43 = vadd.f32 %v846_v12, %v839_v11  ;;  %vm602_vm7 = vcmp.eq.s32.totalorder %v1880_v0, %v1726_v8  ;;  %vm592_vm8 = vcmp.eq.s32.totalorder %v1857_v31, %v1801_v4 }
 0x3da   :  { %1424 = vmatprep.subr.msk.mxu1 %vm628_vm14, %v1565_v25  ;;  %1442 = vmatprep.subr.msk.mxu0 %vm630_vm0, %v1565_v25  ;;  %vm594_vm14 = vcmp.eq.s32.totalorder %v1860_v36, %v1801_v4  ;;  %vm591_vm0 = vcmp.eq.s32.totalorder %v1877_v18, %v1801_v4 }
 0x3db   :  { %v1931_v15 = vsub.f32 %v849_v43, %v1926_v14  ;;  %1425 = vmatpush1.msk.msra.mxu1 %vm627_vm9, %v1565_v25  ;;  %1443 = vmatpush1.msk.msra.mxu0 %vm629_vm1, %v1565_v25  ;;  %vm593_vm9 = vcmp.eq.s32.totalorder %v1880_v0, %v1801_v4  ;;  %vm583_vm1 = vcmp.eq.s32.totalorder %v1857_v31, %v1824_v55 }
 0x3dc   :  { %1426 = vmatprep.subr.msk.mxu1 %vm619_vm2, %v1565_v25  ;;  %1444 = vmatprep.subr.msk.mxu0 %vm621_vm3, %v1565_v25  ;;  %vm585_vm2 = vcmp.eq.s32.totalorder %v1860_v36, %v1824_v55  ;;  %vm582_vm3 = vcmp.eq.s32.totalorder %v1877_v18, %v1824_v55 }
 0x3dd   :  { %966 = vmatprep.mubr.f32.mxu1 %v1561_v20  ;;  %1043 = vmatprep.mubr.f32.mxu0 %v1561_v20 }
 0x3de   :  { %1427 = vmatpush1.msk.msra.mxu1 %vm618_vm10, %v1565_v25  ;;  %1445 = vmatpush1.msk.msra.mxu0 %vm620_vm13, %v1565_v25  ;;  %vm584_vm10 = vcmp.eq.s32.totalorder %v1880_v0, %v1824_v55  ;;  %vm574_vm13 = vcmp.eq.s32.totalorder %v1857_v31, %v1836_v56 }
 0x3df   :  { %1401 = vmatmul.mubr.msk.f32.gmra.mxu1 %vm194_vm11, %v1931_v15  ;;  %1419 = vmatmul.mubr.msk.f32.gmra.mxu0 %vm194_vm11, %v1931_v15 }
 0x3e0   :  { %1070 = vmatprep.subr.mxu1 %v1561_v20  ;;  %1446 = vmatprep.subr.msk.mxu0 %vm612_vm15, %v1565_v25  ;;  %vm576_vm15 = vcmp.eq.s32.totalorder %v1860_v36, %v1836_v56 }
 0x3e1   :  { %1071 = vmatpush1.msra.mxu1 %v1561_v20  ;;  %1148 = vmatpush1.msra.mxu0 %v1561_v20 }
 0x3e2   :  { %1428 = vmatprep.subr.msk.mxu1 %vm601_vm4, %v1565_v25  ;;  %1447 = vmatprep.subr.msk.mxu0 %vm603_vm5, %v1565_v25  ;;  %vm573_vm4 = vcmp.eq.s32.totalorder %v1877_v18, %v1836_v56  ;;  %vm575_vm5 = vcmp.eq.s32.totalorder %v1880_v0, %v1836_v56 }
 0x3e3   :  { %1429 = vmatpush1.msk.msra.mxu1 %vm600_vm6, %v1565_v25  ;;  %1448 = vmatpush1.msk.msra.mxu0 %vm602_vm7, %v1565_v25  ;;  %vm649_vm6 = vcmp.eq.s32.totalorder %v559_v19, %v1703_v51  ;;  %vm566_vm7 = vcmp.eq.s32.totalorder %v1880_v0, %v532_v23 }
 0x3e4   :  { %1430 = vmatprep.subr.msk.mxu1 %vm592_vm8, %v1565_v25  ;;  %1449 = vmatprep.subr.msk.mxu0 %vm594_vm14, %v1565_v25  ;;  %v1383_v22 = vsel %vm649_vm6, 1.0, %v1561_v20  ;;  %vm640_vm8 = vcmp.eq.s32.totalorder %v559_v19, %v1735_v17  ;;  %vm631_vm14 = vcmp.eq.s32.totalorder %v559_v19, %v1750_v26 }
 0x3e5   :  { %1431 = vmatpush1.msk.msra.mxu1 %vm591_vm0, %v1565_v25  ;;  %1450 = vmatpush1.msk.msra.mxu0 %vm593_vm9, %v1565_v25  ;;  %vm622_vm0 = vcmp.eq.s32.totalorder %v559_v19, %v1765_v34  ;;  %vm595_vm9 = vcmp.eq.s32.totalorder %v559_v19, %v1801_v4 }
 0x3e6   :  { %1432 = vmatprep.subr.msk.mxu1 %vm583_vm1, %v1565_v25  ;;  %1451 = vmatprep.subr.msk.mxu0 %vm585_vm2, %v1565_v25  ;;  %vm586_vm1 = vcmp.eq.s32.totalorder %v559_v19, %v1824_v55  ;;  %vm577_vm2 = vcmp.eq.s32.totalorder %v559_v19, %v1836_v56 }
 0x3e7   :  { %1433 = vmatpush1.msk.msra.mxu1 %vm582_vm3, %v1565_v25  ;;  %1452 = vmatpush1.msk.msra.mxu0 %vm584_vm10, %v1565_v25  ;;  %vm1287_vm3 = vcmask 949248  }
 0x3e8   :  { %1434 = vmatprep.subr.msk.mxu1 %vm574_vm13, %v1565_v25  ;;  %1453 = vmatprep.subr.msk.mxu0 %vm576_vm15, %v1565_v25 }
 0x3e9   :  { %1435 = vmatpush1.msk.msra.mxu1 %vm573_vm4, %v1565_v25  ;;  %1454 = vmatpush1.msk.msra.mxu0 %vm575_vm5, %v1565_v25 }
 0x3ea   :  { %1080 = vmatprep.subr.mxu1 %v1561_v20  ;;  %1157 = vmatprep.subr.mxu0 %v1561_v20 }
 0x3eb   :  { %1081 = vmatpush1.msra.mxu1 %v1561_v20  ;;  %1114 = vmatprep.mubr.f32.mxu1 %v1561_v20 }
 0x3ec   :  { %1455 = vmatpush1.msk.msra.mxu0 %vm566_vm7, %v1565_v25  ;;  %1191 = vmatprep.mubr.f32.mxu0 %v1561_v20 }
 0x3ed   :  { %1436 = vmatmul.mubr.msk.f32.vlgmr.msra.gmra.mxu1 %vm194_vm11, %v1891_v7  ;;  %1456 = vmatmul.mubr.msk.f32.vlgmr.msra.gmra.mxu0 %vm194_vm11, %v1891_v7 }
 0x3ee   :  { %1500 = vmatprep.subr.msk.mxu1 %vm868_vm12, %v1383_v22  ;;  %1120 = vmatprep.mubr.f32.mxu1 %v1561_v20 }
 0x3ef   :  { %1501 = vmatpush3.msk.msra.mxu1 %vm868_vm12, %v1383_v22  ;;  %1197 = vmatprep.mubr.f32.mxu0 %v1561_v20  ;;  %vm604_vm12 = vcmp.eq.s32.totalorder %v559_v19, %v1726_v8 }
 0x3f0   :  { %1502 = vmatprep.subr.msk.mxu1 %vm640_vm8, %v1565_v25 }
 0x3f1   :  { %1503 = vmatpush3.msk.msra.mxu1 %vm640_vm8, %v1565_v25  ;;  %1457 = vmatmul.mubr.msk.f32.gmra.mxu0 %vm194_vm11, %v1931_v15 }
 0x3f2   :  { %1437 = vmatmul.mubr.msk.f32.gmra.mxu1 %vm194_vm11, %v1931_v15  ;;  %1504 = vmatprep.subr.msk.mxu1 %vm631_vm14, %v1565_v25 }
 0x3f3   :  { %1505 = vmatpush3.msk.msra.mxu1 %vm631_vm14, %v1565_v25  ;;  %1520 = vmatprep.mubr.msk.f32.mxu1 %vm194_vm11, %v1891_v7 }
 0x3f4   :  { %1506 = vmatprep.subr.msk.mxu1 %vm622_vm0, %v1565_v25 }
 0x3f5   :  { %1507 = vmatpush3.msk.msra.mxu1 %vm622_vm0, %v1565_v25 }
 0x3f6   :  { %1508 = vmatprep.subr.mxu1 %v1561_v20 }
 0x3f7   :  { %1509 = vmatpush3.msra.mxu1 %v1561_v20 }
 0x3f8   :  { %1510 = vmatprep.subr.msk.mxu1 %vm604_vm12, %v1565_v25 }
 0x3f9   :  { %1511 = vmatpush3.msk.msra.mxu1 %vm604_vm12, %v1565_v25 }
 0x3fa   :  { %1512 = vmatprep.subr.msk.mxu1 %vm595_vm9, %v1565_v25 }
 0x3fb   :  { %1513 = vmatpush3.msk.msra.mxu1 %vm595_vm9, %v1565_v25 }
 0x3fc   :  { %1514 = vmatprep.subr.msk.mxu1 %vm586_vm1, %v1565_v25 }
 0x3fd   :  { %1515 = vmatpush3.msk.msra.mxu1 %vm586_vm1, %v1565_v25 }
 0x3fe   :  { %1516 = vmatprep.subr.msk.mxu1 %vm577_vm2, %v1565_v25 }
 0x3ff   :  { %1517 = vmatpush3.msk.msra.mxu1 %vm577_vm2, %v1565_v25 }
 0x400   :  { %1518 = vmatprep.subr.mxu1 %v1561_v20 }
 0x401   :  { %1519 = vmatpush3.msra.mxu1 %v1561_v20 }
 0x402   :  { %1521 = vmatmul.mubr.msk.f32.vlgmr.msra.gmra.mxu1 %vm194_vm11, %v1931_v15  ;;  %vm1297_vm11 = vcmask 945152  }
 0x496   :  { %v962_v30 = vpop.f32.mrf.mxu1  ;;  %v1039_v51 = vpop.f32.mrf.mxu0 }
 0x497   :  { %v963_v8 = vadd.f32 %v962_v30, %v1888_v24  ;;  %v1040_v17 = vadd.f32 %v1039_v51, %v1888_v24 }
 0x498   :  { %v964_v26 = vpop.f32.mrf.mxu1  ;;  %v1041_v27 = vpop.f32.mrf.mxu0 }
 0x499   :  { %1279 = vst [vmem:[%s2129_s3] sm:$0xff] %v963_v8  ;;  %1281 = vst [vmem:[%s2129_s3 + $0x10] sm:$0xff] %v1040_v17  ;;  %v965_v20 = vadd.f32 %v964_v26, %v1888_v24  ;;  %v1042_v25 = vadd.f32 %v1041_v27, %v1888_v24 }
 0x49b   :  { %1280 = vst [vmem:[%s2129_s3 + $0x8] sm:$0xff] %v965_v20  ;;  %1282 = vst [vmem:[%s2129_s3 + $0x18] sm:$0xff] %v1042_v25 }
 0x49f   :  { %v968_v28 = vpop.f32.mrf.mxu1  ;;  %v1045_v32 = vpop.f32.mrf.mxu0 }
 0x4a0   :  { %v969_v33 = vadd.f32 %v968_v28, %v1926_v14  ;;  %v1046_v34 = vadd.f32 %v1045_v32, %v1926_v14 }
 0x4a1   :  { %v970_v35 = vpop.f32.mrf.mxu1  ;;  %v1047_v21 = vpop.f32.mrf.mxu0 }
 0x4a2   :  { %1289 = vst [vmem:[%s2129_s3 + $0x48] sm:$0xf] %v969_v33  ;;  %1291 = vst [vmem:[%s2129_s3 + $0x58] sm:$0xf] %v1046_v34  ;;  %v971_v39 = vadd.f32 %v970_v35, %v1926_v14  ;;  %v1048_v38 = vadd.f32 %v1047_v21, %v1926_v14 }
 0x4a4   :  { %1290 = vst [vmem:[%s2129_s3 + $0x50] sm:$0xf] %v971_v39  ;;  %1292 = vst [vmem:[%s2129_s3 + $0x60] sm:$0xf] %v1048_v38 }
 0x4ad   :  { %v1116_v40 = vpop.f32.mrf.mxu1  ;;  %v1193_v41 = vpop.f32.mrf.mxu0 }
 0x4ae   :  { %v1117_v42 = vadd.f32 %v1116_v40, %v1888_v24  ;;  %v1194_v44 = vadd.f32 %v1193_v41, %v1888_v24 }
 0x4af   :  { %v1118_v45 = vpop.f32.mrf.mxu1  ;;  %v1195_v47 = vpop.f32.mrf.mxu0 }
 0x4b0   :  { %1283 = vst [vmem:[%s2129_s3 + $0x20] sm:$0xff] %v1117_v42  ;;  %1285 = vst [vmem:[%s2129_s3 + $0x30] sm:$0xff] %v1194_v44  ;;  %v1119_v48 = vadd.f32 %v1118_v45, %v1888_v24  ;;  %v1196_v4 = vadd.f32 %v1195_v47, %v1888_v24 }
 0x4b1   :  { %v1199_v49 = vpop.f32.mrf.mxu0 }
 0x4b2   :  { %1284 = vst [vmem:[%s2129_s3 + $0x28] sm:$0xff] %v1119_v48  ;;  %1286 = vst [vmem:[%s2129_s3 + $0x38] sm:$0xff] %v1196_v4  ;;  %v1122_v50 = vpop.f32.mrf.mxu1  ;;  %v1200_v52 = vadd.f32 %v1199_v49, %v1926_v14 }
 0x4b3   :  { %v1123_v53 = vadd.f32 %v1122_v50, %v1926_v14  ;;  %v1201_v54 = vpop.f32.mrf.mxu0 }
 0x4b4   :  { %1295 = vst [vmem:[%s2129_s3 + $0x78] sm:$0xf] %v1200_v52  ;;  %v1124_v55 = vpop.f32.mrf.mxu1  ;;  %v1202_v2 = vadd.f32 %v1201_v54, %v1926_v14 }
 0x4b5   :  { %1293 = vst [vmem:[%s2129_s3 + $0x68] sm:$0xf] %v1123_v53  ;;  %v1125_v56 = vadd.f32 %v1124_v55, %v1926_v14 }
 0x4b6   :  { %1296 = vst [vmem:[%s2129_s3 + $0x80] sm:$0xf] %v1202_v2 }
 0x4b7   :  { %1294 = vst [vmem:[%s2129_s3 + $0x70] sm:$0xf] %v1125_v56 }
 0x4c2   :  { %v1522_v31 = vpop.f32.mrf.mxu1 }
 0x4c3   :  { %v1276_v36 = vadd.f32 %v1522_v31, %v1926_v14 }
 0x4c4   :  { %v1270_v37 = vpop.f32.mrf.mxu1 }
 0x4c5   :  { %1298 = vst.msk [vmem:[%s2129_s3 + $0x88] sm:$0xf] %vm1297_vm11, %v1276_v36  ;;  %v1271_v57 = vadd.f32 %v1270_v37, %v1888_v24 }
 0x4c7   :  { %1288 = vst.msk [vmem:[%s2129_s3 + $0x40] sm:$0xff] %vm1287_vm3, %v1271_v57 }

</bundles_post_ra>
